<compile_context>
chip_gen: v7x
topology: tpu7x:2x2x1
jax: 0.10.0
libtpu: 0.0.40
codegen_flags: <defaults>
</compile_context>

<pallas_src>
import functools

import jax
import jax.numpy as jnp
from jax.experimental import pallas as pl
from jax.experimental.pallas import tpu as pltpu


_DEFAULT_BLOCK_BUDGET = 6 * 1024 * 1024      # bytes per streamed input block
_DEFAULT_FUSED_THRESHOLD = 6 * 1024 * 1024   # B*D*4 below this -> fused kernel
_DEFAULT_VMEM_LIMIT = 48 * 1024 * 1024       # scoped VMEM limit for all calls


def _round_up(x, m):
    return ((x + m - 1) // m) * m


def _cdiv(a, b):
    return (a + b - 1) // b


def _tile_rows(rows, row_bytes, granule, budget_bytes):
    """Row-tile size (multiple of the sublane granule) from a byte budget."""
    tb = (budget_bytes // max(row_bytes, 1)) // granule * granule
    tb = max(tb, granule)
    tb = min(tb, _round_up(rows, granule))
    return tb, _cdiv(rows, tb)


# ---------- Fused path: reduce + finalize + normalize in one kernel ----------
def _fused_kernel(count_ref, batch_ref, acc_sum_ref, acc_sq_ref,
                  out_ref, new_sum_ref, new_sq_ref, *, epsilon, training):
    b = batch_ref[...].astype(jnp.float32)
    if training:
        new_sum = acc_sum_ref[...] + jnp.sum(b, axis=0, keepdims=True)
        new_sq = acc_sq_ref[...] + jnp.sum(b * b, axis=0, keepdims=True)
    else:
        new_sum = acc_sum_ref[...]
        new_sq = acc_sq_ref[...]
    new_sum_ref[...] = new_sum
    new_sq_ref[...] = new_sq

    count_safe = jnp.maximum(count_ref[0], jnp.float32(1.0))
    mean = new_sum / count_safe
    var = new_sq / count_safe - mean * mean
    # NOTE: like the PyTorch module, var can go slightly negative from rounding
    # (E[x^2] - mean^2); we keep exact parity (sqrt(neg) -> NaN).
    std = jnp.maximum(jnp.sqrt(var), jnp.float32(epsilon))
    inv_std = pl.reciprocal(std, approx=False)
    out_ref[...] = ((b - mean) * inv_std).astype(out_ref.dtype)


# ---------- Pass 1 (training, tiled): column-split streaming reduce ----------
def _reduce_kernel(batch_ref, acc_sum_ref, acc_sq_ref, new_sum_ref, new_sq_ref,
                   *, rows_total, tile_rows, need_mask):
    i = pl.program_id(1)   # row-tile index (inner, "arbitrary")

    @pl.when(i == 0)
    def _():
        # Accumulate directly into the resident output block (no extra scratch).
        new_sum_ref[...] = acc_sum_ref[...]
        new_sq_ref[...] = acc_sq_ref[...]

    b = batch_ref[...].astype(jnp.float32)
    if need_mask:
        # Ragged last tile: edge-block reads are undefined -> zero them out.
        row = i * tile_rows + jax.lax.broadcasted_iota(jnp.int32, b.shape, 0)
        b = jnp.where(row < rows_total, b, jnp.float32(0.0))

    # VPU column reduce; with bf16 inputs on v7x this could be offloaded to the
    # MXU (ones(1, tb) @ b) if a bundle dump shows the VALU slot saturating.
    new_sum_ref[...] += jnp.sum(b, axis=0, keepdims=True)
    new_sq_ref[...] += jnp.sum(b * b, axis=0, keepdims=True)


# ---------- Pass 2 (tiled): streaming normalize (finalize fused per tile) ----
def _normalize_kernel(count_ref, batch_ref, sum_ref, sq_ref, out_ref, *, epsilon):
    # Finalizing mean / inv_std on a (1, D) row per tile is hidden under the
    # streaming DMA (EUP slack); it also keeps the "parallel" grid axis safe on
    # megacore (no cross-iteration scratch init needed).
    count_safe = jnp.maximum(count_ref[0], jnp.float32(1.0))
    mean = sum_ref[...] / count_safe
    var = sq_ref[...] / count_safe - mean * mean
    std = jnp.maximum(jnp.sqrt(var), jnp.float32(epsilon))
    inv_std = pl.reciprocal(std, approx=False)

    b = batch_ref[...].astype(jnp.float32)
    out_ref[...] = ((b - mean) * inv_std).astype(out_ref.dtype)


def accumulated_normalization(batch, acc_sum, acc_squared_sum, acc_count,
                              num_accumulations, *, epsilon=1e-8, training=True,
                              block_budget_bytes=_DEFAULT_BLOCK_BUDGET,
                              fused_threshold_bytes=_DEFAULT_FUSED_THRESHOLD,
                              vmem_limit_bytes=_DEFAULT_VMEM_LIMIT):
    """Functional forward of AccumulatedNormalization.

    Args:
      batch:             (B, D) float
      acc_sum:           (D,)  running sum buffer
      acc_squared_sum:   (D,)  running squared-sum buffer
      acc_count:         (1,)  running element count
      num_accumulations: (1,)  running update count
    Returns:
      (normalized_batch, new_acc_sum, new_acc_squared_sum,
       new_acc_count, new_num_accumulations)
    """
    B, D = batch.shape

    acc_sum2d = jnp.reshape(acc_sum.astype(jnp.float32), (1, D))
    acc_sq2d = jnp.reshape(acc_squared_sum.astype(jnp.float32), (1, D))
    count = jnp.reshape(acc_count.astype(jnp.float32), (1,))
    num = jnp.reshape(num_accumulations.astype(jnp.float32), (1,))

    # Counter updates are trivial scalar ops; doing them wrapper-side keeps the
    # column-split reduce pass free of shared scalar outputs.
    if training:
        new_count = count + jnp.float32(B)
        new_num = num + jnp.float32(1.0)
    else:
        new_count = count
        new_num = num

    itemsize = batch.dtype.itemsize
    granule = {4: 8, 2: 16, 1: 32}.get(itemsize, 8)   # dtype-aware sublane pack

    # ---- Fused single-kernel path: batch fits in VMEM -> 1 read + 1 write ----
    if B * D * 4 <= fused_threshold_bytes:
        out, new_sum2d, new_sq2d = pl.pallas_call(
            functools.partial(_fused_kernel, epsilon=epsilon, training=training),
            out_shape=(
                jax.ShapeDtypeStruct((B, D), batch.dtype),
                jax.ShapeDtypeStruct((1, D), jnp.float32),
                jax.ShapeDtypeStruct((1, D), jnp.float32),
            ),
            in_specs=[pl.BlockSpec(memory_space=pltpu.SMEM),
                      pl.BlockSpec(memory_space=pltpu.VMEM),
                      pl.BlockSpec(memory_space=pltpu.VMEM),
                      pl.BlockSpec(memory_space=pltpu.VMEM)],
            out_specs=(pl.BlockSpec(memory_space=pltpu.VMEM),
                       pl.BlockSpec(memory_space=pltpu.VMEM),
                       pl.BlockSpec(memory_space=pltpu.VMEM)),
            compiler_params=pltpu.CompilerParams(
                vmem_limit_bytes=vmem_limit_bytes),
        )(new_count, batch, acc_sum2d, acc_sq2d)
        return out, new_sum2d[0], new_sq2d[0], new_count, new_num

    # ---- Tiled path ----
    if training:
        # Split D into two halves when possible so both v7x TCs reduce
        # ("parallel" leading axis); step count unchanged on 1-TC chips.
        ncol = 2 if (D % 256 == 0) else 1
        dcol = D // ncol
        tb1, nb1 = _tile_rows(B, dcol * itemsize, granule, block_budget_bytes)
        need_mask = (B % tb1) != 0

        new_sum2d, new_sq2d = pl.pallas_call(
            functools.partial(_reduce_kernel, rows_total=B, tile_rows=tb1,
                              need_mask=need_mask),
            grid=(ncol, nb1),
            out_shape=(
                jax.ShapeDtypeStruct((1, D), jnp.float32),
                jax.ShapeDtypeStruct((1, D), jnp.float32),
            ),
            in_specs=[pl.BlockSpec((tb1, dcol), lambda c, i: (i, c)),
                      pl.BlockSpec((1, dcol), lambda c, i: (0, c)),
                      pl.BlockSpec((1, dcol), lambda c, i: (0, c))],
            out_specs=(pl.BlockSpec((1, dcol), lambda c, i: (0, c)),
                       pl.BlockSpec((1, dcol), lambda c, i: (0, c))),
            compiler_params=pltpu.CompilerParams(
                dimension_semantics=("parallel", "arbitrary"),
                vmem_limit_bytes=vmem_limit_bytes),
        )(batch, acc_sum2d, acc_sq2d)
        sum2d, sq2d = new_sum2d, new_sq2d
    else:
        # Inference: buffers untouched; normalize directly from existing stats.
        new_sum2d, new_sq2d = acc_sum2d, acc_sq2d
        sum2d, sq2d = acc_sum2d, acc_sq2d

    tb2, nb2 = _tile_rows(B, D * itemsize, granule, block_budget_bytes)
    out = pl.pallas_call(
        functools.partial(_normalize_kernel, epsilon=epsilon),
        grid=(nb2,),
        out_shape=jax.ShapeDtypeStruct((B, D), batch.dtype),
        in_specs=[pl.BlockSpec(memory_space=pltpu.SMEM),
                  pl.BlockSpec((tb2, D), lambda i: (i, 0)),
                  pl.BlockSpec((1, D), lambda i: (0, 0)),
                  pl.BlockSpec((1, D), lambda i: (0, 0))],
        out_specs=pl.BlockSpec((tb2, D), lambda i: (i, 0)),
        compiler_params=pltpu.CompilerParams(
            dimension_semantics=("parallel",),   # shards over v7x's 2 TCs
            vmem_limit_bytes=vmem_limit_bytes),
    )(new_count, batch, sum2d, sq2d)

    return out, new_sum2d[0], new_sq2d[0], new_count, new_num


def _reference(batch, acc_sum, acc_sq, acc_count, num_acc, epsilon=1e-8,
               training=True):
    if training:
        acc_sum = acc_sum + batch.sum(axis=0)
        acc_sq = acc_sq + (batch ** 2).sum(axis=0)
        acc_count = acc_count + batch.shape[0]
        num_acc = num_acc + 1.0
    count_safe = jnp.maximum(acc_count, 1.0)
    mean = acc_sum / count_safe
    std = jnp.maximum(jnp.sqrt(acc_sq / count_safe - mean ** 2), epsilon)
    return (batch - mean) / std, acc_sum, acc_sq, acc_count, num_acc


if __name__ == "__main__":
    base_key = jax.random.PRNGKey(0)

    def run_case(B, D, training, **kwargs):
        k1, k2 = jax.random.split(jax.random.fold_in(base_key, B * 1000 + D))
        batch = jax.random.normal(k1, (B, D), dtype=jnp.float32) * 2.0 + 0.5

        # Non-trivial initial buffer state (as if 16 rows were already seen).
        prev = jax.random.normal(k2, (16, D), dtype=jnp.float32)
        acc_sum = prev.sum(axis=0)
        acc_squared_sum = (prev ** 2).sum(axis=0)
        acc_count = jnp.array([16.0], dtype=jnp.float32)
        num_accumulations = jnp.array([2.0], dtype=jnp.float32)

        out, ns, nq, nc, nn = accumulated_normalization(
            batch, acc_sum, acc_squared_sum, acc_count, num_accumulations,
            training=training, **kwargs)
        jax.block_until_ready(out)

        ref_out, rns, rnq, rnc, rnn = _reference(
            batch, acc_sum, acc_squared_sum, acc_count, num_accumulations,
            training=training)

        assert jnp.allclose(out, ref_out, atol=1e-5, rtol=1e-5), (B, D, training)
        assert jnp.allclose(ns, rns, atol=1e-4, rtol=1e-5), (B, D, training)
        assert jnp.allclose(nq, rnq, atol=1e-4, rtol=1e-5), (B, D, training)
        assert jnp.allclose(nc, rnc), (B, D, training)
        assert jnp.allclose(nn, rnn), (B, D, training)

    # Fused (VMEM-resident) path.
    run_case(8, 128, True)      # aligned shapes, training
    run_case(13, 96, True)      # ragged rows + non-128 D (no padding anywhere)
    run_case(8, 128, False)     # inference (buffers unchanged)

    # Tiled path forced via tiny budgets (exercises masked reduce remainder,
    # the column-split reduce, and dropped OOB writes in the normalize pass).
    tiled = dict(block_budget_bytes=4096, fused_threshold_bytes=0)
    run_case(29, 256, True, **tiled)    # ncol=2 split, ragged row tiles
    run_case(29, 96, True, **tiled)     # ncol=1, non-128 D, ragged row tiles
    run_case(29, 96, False, **tiled)    # tiled inference (normalize only)

    print("KERNEL_OK")
</pallas_src>

<mosaic_0001>
module attributes {stable_mosaic.version = 11 : i64} {
  func.func @_fused_kernel(%arg0: memref<1xf32, #tpu.memory_space<smem>>, %arg1: memref<8x128xf32, #tpu.memory_space<vmem>>, %arg2: memref<1x128xf32, #tpu.memory_space<vmem>>, %arg3: memref<1x128xf32, #tpu.memory_space<vmem>>, %arg4: memref<8x128xf32, #tpu.memory_space<vmem>>, %arg5: memref<1x128xf32, #tpu.memory_space<vmem>>, %arg6: memref<1x128xf32, #tpu.memory_space<vmem>>) attributes {dimension_semantics = [], scalar_prefetch = 0 : i64, scratch_operands = 0 : i64, tpu.core_type = #tpu.core_type<tc>} {
    %c0 = arith.constant 0 : index
    %c0_0 = arith.constant 0 : index
    %0 = vector.load %arg1[%c0, %c0_0] : memref<8x128xf32, #tpu.memory_space<vmem>>, vector<8x128xf32>
    %c0_1 = arith.constant 0 : index
    %c0_2 = arith.constant 0 : index
    %1 = vector.load %arg2[%c0_1, %c0_2] : memref<1x128xf32, #tpu.memory_space<vmem>>, vector<1x128xf32>
    %cst = arith.constant dense<0.000000e+00> : vector<128xf32>
    %2 = vector.multi_reduction <add>, %0, %cst [0] : vector<8x128xf32> to vector<128xf32>
    %3 = vector.shape_cast %2 : vector<128xf32> to vector<1x128xf32>
    %4 = arith.addf %1, %3 : vector<1x128xf32>
    %c0_3 = arith.constant 0 : index
    %c0_4 = arith.constant 0 : index
    %5 = vector.load %arg3[%c0_3, %c0_4] : memref<1x128xf32, #tpu.memory_space<vmem>>, vector<1x128xf32>
    %6 = arith.mulf %0, %0 : vector<8x128xf32>
    %cst_5 = arith.constant dense<0.000000e+00> : vector<128xf32>
    %7 = vector.multi_reduction <add>, %6, %cst_5 [0] : vector<8x128xf32> to vector<128xf32>
    %8 = vector.shape_cast %7 : vector<128xf32> to vector<1x128xf32>
    %9 = arith.addf %5, %8 : vector<1x128xf32>
    %c0_6 = arith.constant 0 : index
    %c0_7 = arith.constant 0 : index
    %10 = vector.load %arg5[%c0_6, %c0_7] : memref<1x128xf32, #tpu.memory_space<vmem>>, vector<1x128xf32>
    tpu.vector_store %arg5[%c0_6, %c0_7], %4 {strides = array<i32>} : memref<1x128xf32, #tpu.memory_space<vmem>>, vector<1x128xf32>,
    %c0_8 = arith.constant 0 : index
    %c0_9 = arith.constant 0 : index
    %11 = vector.load %arg6[%c0_8, %c0_9] : memref<1x128xf32, #tpu.memory_space<vmem>>, vector<1x128xf32>
    tpu.vector_store %arg6[%c0_8, %c0_9], %9 {strides = array<i32>} : memref<1x128xf32, #tpu.memory_space<vmem>>, vector<1x128xf32>,
    %c0_10 = arith.constant 0 : index
    %12 = memref.load %arg0[%c0_10] : memref<1xf32, #tpu.memory_space<smem>>
    %cst_11 = arith.constant 1.000000e+00 : f32
    %13 = arith.maximumf %12, %cst_11 : f32
    %14 = vector.broadcast %13 : f32 to vector<1x128xf32>
    %15 = arith.divf %4, %14 : vector<1x128xf32>
    %16 = vector.broadcast %13 : f32 to vector<1x128xf32>
    %17 = arith.divf %9, %16 : vector<1x128xf32>
    %18 = arith.mulf %15, %15 : vector<1x128xf32>
    %19 = arith.subf %17, %18 : vector<1x128xf32>
    %20 = math.sqrt %19 : vector<1x128xf32>
    %cst_12 = arith.constant 9.99999993E-9 : f32
    %21 = vector.broadcast %cst_12 : f32 to vector<1x128xf32>
    %22 = arith.maximumf %20, %21 : vector<1x128xf32>
    %23 = tpu.reciprocal %22 : vector<1x128xf32> -> vector<1x128xf32>
    %24 = vector.broadcast %15 : vector<1x128xf32> to vector<8x128xf32>
    %25 = arith.subf %0, %24 : vector<8x128xf32>
    %26 = vector.broadcast %23 : vector<1x128xf32> to vector<8x128xf32>
    %27 = arith.mulf %25, %26 : vector<8x128xf32>
    %c0_13 = arith.constant 0 : index
    %c0_14 = arith.constant 0 : index
    %28 = vector.load %arg4[%c0_13, %c0_14] : memref<8x128xf32, #tpu.memory_space<vmem>>, vector<8x128xf32>
    tpu.vector_store %arg4[%c0_13, %c0_14], %27 {strides = array<i32>} : memref<8x128xf32, #tpu.memory_space<vmem>>, vector<8x128xf32>,
    return
  }
}

</mosaic_0001>

<bundles_post_ra>
// kernel: tpu_custom_call.1
= control target key start
LH: loop header
LB: loop body
LE: loop exit
PB: predicated region body
PF: predicated region fallthrough
CT: control target
= control target key end

     0   :  { %13 = vsyncpa [#allocation4], 0  ;;  %s346_s0 = inlined_call_operand.<no memory space> [shape: f32[1], index: 0, kind: input, shape index: {}]   ;;  %s347_s1 = inlined_call_operand.hbm [shape: f32[8,128], index: 1, kind: input, shape index: {}]   ;;  %s348_s2 = inlined_call_operand.vmem [shape: f32[1,128], index: 2, kind: input, shape index: {}]   ;;  %s349_s3 = inlined_call_operand.vmem [shape: f32[1,128], index: 3, kind: input, shape index: {}]   ;;  %s350_s4 = inlined_call_operand.hbm [shape: f32[8,128], index: 4, kind: output, shape index: {0}]   ;;  %s351_s5 = inlined_call_operand.hbm [shape: f32[1,128], index: 5, kind: output, shape index: {1}]   ;;  %s352_s6 = inlined_call_operand.hbm [shape: f32[1,128], index: 6, kind: output, shape index: {2}]  }
   0x1   :  { %14 = vsyncpa [#allocation5], 0 }
   0x2   :  { %15 = vsyncpa [#allocation8], 0  ;;  %s234_s21 = smov [#allocation3]   ;;  %s140_s25 = scalar_lea.hbm %s347_s1, 128 }
   0x3   :  { %s24_s22 = sshll.u32 %s234_s21, 4  ;;  %p141_p0 = scmp.ne.s32.totalorder %s347_s1, %s140_s25  ;;  %s25_s22 = int_to_ptr.vmem [resolvable:$true] %s24_s22 }
   0x4   :  { %p144_p1 = scmp.lt.u32.totalorder %s140_s25, %s347_s1 }
   0x6   :  { %p146_p2 = pnand %p144_p1, %p141_p0 }
   0x8   :  { %149 = shalt.err (!%p146_p2)
}
   0x9   :  { %s150_s30 = scalar_lea.vmem %s25_s22, 128  ;;  %p155_p4 = scmp.lt.s32.totalorder %s25_s22, %s25_s22 }
   0xa   :  { %p151_p3 = scmp.ne.s32.totalorder %s25_s22, %s150_s30  ;;  %p156_p5 = scmp.lt.s32.totalorder %s150_s30, %s150_s30 }
   0xc   :  { %p157_p6 = por %p156_p5, %p155_p4 }
   0xe   :  { %p158_p7 = pnand %p157_p6, %p151_p3 }
  0x10   :  { %161 = shalt.err (!%p158_p7)
}
  0x11   :  { %27 = dma.hbm_to_vmem [thread:$0]  %s347_s1, 128, %s25_s22, [#allocation4]  }
  0x12   :  { %228 = dma.done.wait [#allocation4], 128  }
  0x13   :  { %229 = vsyncadd [#allocation4], 4294967168  ;;  %s235_s9 = smov 1.0   ;;  %v289_v1 = vld [vmem:[#allocation3] sm:$0xff]  ;;  %s236_s13 = smov [#allocation7]  }
  0x14   :  { %s56_s12 = smax.f32 %s235_s9, %s346_s0  ;;  %v37_v2 = vrot.slane %v289_v1, 4  ;;  %v45_v3 = vmul.f32 %v289_v1, %v289_v1  ;;  %v36_v12 = vld [vmem:[%s348_s2] sm:$0x1]  ;;  %s103_s14 = sshll.u32 %s236_s13, 4  ;;  %s104_s14 = int_to_ptr.vmem [resolvable:$true] %s103_s14 }
  0x15   :  { %v57_v0 = vstv %s56_s12  ;;  %v44_v16 = vld [vmem:[%s349_s3] sm:$0x1]  ;;  %s237_s17 = smov [#allocation9]   ;;  %s162_s2 = scalar_lea.vmem %s104_s14, 16 }
  0x16   :  { %134 = vrcp.f32 %v57_v0  ;;  %v38_v4 = vadd.f32 %v37_v2, %v289_v1  ;;  %v46_v5 = vrot.slane %v45_v3, 4  ;;  %s113_s18 = sshll.u32 %s237_s17, 4  ;;  %p163_p8 = scmp.ne.s32.totalorder %s104_s14, %s162_s2  ;;  %s301_s18 = int_to_ptr.vmem [resolvable:$true] %s113_s18 }
  0x17   :  { %s166_s19 = scalar_lea.vmem %s104_s14, 32  ;;  %p167_p9 = scmp.lt.s32.totalorder %s104_s14, %s104_s14 }
  0x18   :  { %v39_v6 = vrot.slane %v38_v4, 2  ;;  %v47_v7 = vadd.f32 %v46_v5, %v45_v3  ;;  %p168_p10 = scmp.lt.s32.totalorder %s166_s19, %s162_s2 }
  0x1a   :  { %v40_v8 = vadd.f32 %v39_v6, %v38_v4  ;;  %v48_v9 = vrot.slane %v47_v7, 2  ;;  %p169_p11 = por %p168_p10, %p167_p9 }
  0x1c   :  { %v41_v10 = vrot.slane %v40_v8, 1  ;;  %v49_v11 = vadd.f32 %v48_v9, %v47_v7  ;;  %p170_p12 = pnand %p169_p11, %p163_p8 }
  0x1e   :  { %v42_v13 = vadd.f32 %v41_v10, %v40_v8  ;;  %v50_v14 = vrot.slane %v49_v11, 1 }
  0x20   :  { %v135_v15 = vpop.eup %134  ;;  %v43_v17 = vadd.f32 %v42_v13, %v36_v12  ;;  %v51_v18 = vadd.f32 %v50_v14, %v49_v11 }
  0x22   :  { %53 = vst [vmem:[#allocation7] sm:$0x1] %v43_v17  ;;  %v59_v19 = vmul.f32 %v135_v15, %v43_v17  ;;  %v52_v20 = vadd.f32 %v51_v18, %v44_v16 }
  0x23   :  { %173 = shalt.err (!%p170_p12)
}
  0x24   :  { %s174_s21 = scalar_lea.hbm %s351_s5, 16 }
  0x25   :  { %p175_p13 = scmp.ne.s32.totalorder %s351_s5, %s174_s21  ;;  %p178_p0 = scmp.lt.u32.totalorder %s174_s21, %s351_s5 }
  0x27   :  { %p180_p1 = pnand %p178_p0, %p175_p13 }
  0x29   :  { %183 = shalt.err (!%p180_p1)
}
  0x2a   :  { %106 = dma.vmem_to_hbm [thread:$0]  %s104_s14, 16, %s351_s5, [#allocation8]   ;;  %v61_v21 = vmul.f32 %v59_v19, %v59_v19  ;;  %54 = vst [vmem:[#allocation9] sm:$0x1] %v52_v20  ;;  %v60_v22 = vmul.f32 %v135_v15, %v52_v20 }
  0x2b   :  { %s184_s28 = scalar_lea.vmem %s301_s18, 16  ;;  %s188_s29 = scalar_lea.vmem %s301_s18, 32 }
  0x2c   :  { %p185_p2 = scmp.ne.s32.totalorder %s301_s18, %s184_s28  ;;  %p189_p3 = scmp.lt.s32.totalorder %s301_s18, %s301_s18 }
  0x2d   :  { %p190_p4 = scmp.lt.s32.totalorder %s188_s29, %s184_s28 }
  0x2f   :  { %p191_p5 = por %p190_p4, %p189_p3 }
  0x31   :  { %p192_p6 = pnand %p191_p5, %p185_p2 }
  0x33   :  { %195 = shalt.err (!%p192_p6)
}
  0x34   :  { %s196_s8 = scalar_lea.hbm %s352_s6, 16 }
  0x35   :  { %p197_p7 = scmp.ne.s32.totalorder %s352_s6, %s196_s8  ;;  %p200_p8 = scmp.lt.u32.totalorder %s196_s8, %s352_s6 }
  0x37   :  { %p202_p9 = pnand %p200_p8, %p197_p7 }
  0x39   :  { %205 = shalt.err (!%p202_p9)
}
  0x3a   :  { %116 = dma.vmem_to_hbm [thread:$0]  %s301_s18, 16, %s352_s6, [#allocation8]   ;;  %v62_v23 = vsub.f32 %v60_v22, %v61_v21  ;;  %v73_v26 = vlaneseq }
  0x3b   :  { %s238_s0 = smov [#allocation6]  }
  0x3c   :  { %136 = vrsqrt.f32 %v62_v23  ;;  %vm65_vm0 = vcmp.eq.f32.partialorder %v62_v23, inf  ;;  %v68_v25 = vand.u32 2147483648, %v62_v23  ;;  %vm67_vm1 = vcmp.eq.f32.partialorder %v62_v23, 0.0  ;;  %s93_s6 = sshll.u32 %s238_s0, 4  ;;  %s94_s6 = int_to_ptr.vmem [resolvable:$true] %s93_s6 }
  0x3d   :  { %v74_v30 = vshrl.u32 %v73_v26, 7  ;;  %s206_s13 = scalar_lea.vmem %s94_s6, 128  ;;  %p211_p11 = scmp.lt.s32.totalorder %s94_s6, %s94_s6 }
  0x3e   :  { %p207_p10 = scmp.ne.s32.totalorder %s94_s6, %s206_s13  ;;  %p212_p12 = scmp.lt.s32.totalorder %s206_s13, %s206_s13 }
  0x3f   :  { %v75_v32 = vsub.s32 0, %v74_v30 }
  0x40   :  { %p213_p13 = por %p212_p12, %p211_p11 }
  0x41   :  { %v76_v33 = vrot.slane %v59_v19, %v75_v32 }
  0x42   :  { %p214_p0 = pnand %p213_p13, %p207_p10 }
  0x43   :  { %v78_v34 = vsub.f32 %v289_v1, %v76_v33 }
  0x46   :  { %v137_v24 = vpop.eup %136 }
  0x47   :  { %v64_v27 = vmul.f32 %v137_v24, %v62_v23 }
  0x49   :  { %v66_v28 = vsel %vm65_vm0, %v62_v23, %v64_v27 }
  0x4a   :  { %v69_v29 = vsel %vm67_vm1, %v68_v25, %v66_v28 }
  0x4b   :  { %v70_v31 = vmax.f32 %v69_v29, 1e-08 }
  0x4d   :  { %138 = vrcp.f32 %v70_v31 }
  0x57   :  { %v139_v35 = vpop.eup %138 }
  0x58   :  { %v83_v36 = vrot.slane %v139_v35, %v75_v32 }
  0x5a   :  { %v85_v37 = vmul.f32 %v83_v36, %v78_v34 }
  0x5c   :  { %86 = vst [vmem:[#allocation6] sm:$0xff] %v85_v37 }
  0x5d   :  { %217 = shalt.err (!%p214_p0)
}
  0x5e   :  { %s218_s16 = scalar_lea.hbm %s350_s4, 128 }
  0x5f   :  { %p219_p1 = scmp.ne.s32.totalorder %s350_s4, %s218_s16  ;;  %p222_p2 = scmp.lt.u32.totalorder %s218_s16, %s350_s4 }
  0x61   :  { %p224_p3 = pnand %p222_p2, %p219_p1 }
  0x63   :  { %227 = shalt.err (!%p224_p3)
}
  0x64   :  { %96 = dma.vmem_to_hbm [thread:$0]  %s94_s6, 128, %s350_s4, [#allocation5]  }
  0x65   :  { %230 = dma.done.wait [#allocation5], 128  }
  0x66   :  { %231 = vsyncadd [#allocation5], 4294967168 }
  0x67   :  { %232 = dma.done.wait [#allocation8], 32  }
  0x68   :  { %233 = vsyncadd [#allocation8], 4294967264 }
  0x69   :  { %126 = vsyncpa [#allocation4], 1 }
  0x6a   :  { %127 = vsyncpa [#allocation5], 1 }
  0x6b   :  { %128 = vsyncpa [#allocation8], 1 }

</bundles_post_ra>
